<compile_context>
chip_gen: v6e
topology: v6e:2x2x1
jax: 0.10.0
libtpu: 0.0.40
codegen_flags: <defaults>
</compile_context>

<pallas_src>
import jax
import jax.numpy as jnp
from jax import lax
from jax.experimental import pallas as pl
from jax.experimental.pallas import tpu as pltpu

_VMEM_LIMIT_BYTES = 48 * 1024 * 1024  # safe on v5e/v6e/v7x; raise for huge tiles


def _lane_tile(m, cap=2048):
    """Largest 128-aligned tile dividing m (capped); full m if not 128-aligned."""
    if m <= cap or m % 128 != 0:
        return m
    t = cap
    while m % t != 0:
        t -= 128
    return t


# ----------------------------------------------------------------------------
# Kernels
# ----------------------------------------------------------------------------
def _first_kernel(p_ref, w_ref, ow_ref):
    # W' = P @ W_flat   (P resident; grid tiles the lane axis of W_flat)
    ow_ref[...] = jnp.dot(
        p_ref[...], w_ref[...], preferred_element_type=jnp.float32
    ).astype(ow_ref.dtype)


def _first_vec_kernel(p_ref, w_ref, b_ref, ow_ref, ob_ref):
    ow_ref[...] = jnp.dot(
        p_ref[...], w_ref[...], preferred_element_type=jnp.float32
    ).astype(ow_ref.dtype)

    @pl.when(pl.program_id(0) == 0)
    def _():
        # 1-D params in row form: B' = B @ P^T  -> lane-dense (nb, n) output.
        ob_ref[...] = lax.dot_general(
            b_ref[...], p_ref[...], (((1,), (1,)), ((), ())),
            preferred_element_type=jnp.float32,
        ).astype(ob_ref.dtype)


def _middle_kernel(pc_ref, pp_ref, w_ref, ow_ref):
    # per spatial slice s: out_s = P_cur @ W_s @ P_prev^T (intermediate in VMEM)
    y = jnp.dot(pc_ref[...], w_ref[0], preferred_element_type=jnp.float32)
    ow_ref[0] = lax.dot_general(
        y, pp_ref[...], (((1,), (1,)), ((), ())),
        preferred_element_type=jnp.float32,
    ).astype(ow_ref.dtype)


def _middle_vec_kernel(pc_ref, pp_ref, w_ref, b_ref, ow_ref, ob_ref):
    y = jnp.dot(pc_ref[...], w_ref[0], preferred_element_type=jnp.float32)
    ow_ref[0] = lax.dot_general(
        y, pp_ref[...], (((1,), (1,)), ((), ())),
        preferred_element_type=jnp.float32,
    ).astype(ow_ref.dtype)

    @pl.when(pl.program_id(0) == 0)
    def _():
        ob_ref[...] = lax.dot_general(
            b_ref[...], pc_ref[...], (((1,), (1,)), ((), ())),
            preferred_element_type=jnp.float32,
        ).astype(ob_ref.dtype)


def _last_kernel(pp_ref, w_ref, ow_ref):
    # per spatial slice s: out_s = W_s @ P_prev^T
    ow_ref[0] = lax.dot_general(
        w_ref[0], pp_ref[...], (((1,), (1,)), ((), ())),
        preferred_element_type=jnp.float32,
    ).astype(ow_ref.dtype)


def _vec_kernel(p_ref, b_ref, ob_ref):
    ob_ref[...] = lax.dot_general(
        b_ref[...], p_ref[...], (((1,), (1,)), ((), ())),
        preferred_element_type=jnp.float32,
    ).astype(ob_ref.dtype)


# ----------------------------------------------------------------------------
# pallas_call wrappers
# ----------------------------------------------------------------------------
def first_layer_apply(Pm, W_flat, B=None):
    """W' = Pm @ W_flat (n, M); optionally B' = B @ Pm^T for stacked 1-D params."""
    n, M = W_flat.shape
    tm = _lane_tile(M)
    grid = (M // tm,)
    p_spec = pl.BlockSpec((n, n), lambda m: (0, 0))
    w_spec = pl.BlockSpec((n, tm), lambda m: (0, m))
    ow_shape = jax.ShapeDtypeStruct((n, M), W_flat.dtype)
    if B is None:
        return pl.pallas_call(
            _first_kernel,
            out_shape=ow_shape,
            grid=grid,
            in_specs=[p_spec, w_spec],
            out_specs=pl.BlockSpec((n, tm), lambda m: (0, m)),
            compiler_params=pltpu.CompilerParams(
                dimension_semantics=("parallel",),
                vmem_limit_bytes=_VMEM_LIMIT_BYTES),
        )(Pm, W_flat)
    nb = B.shape[0]
    b_spec = pl.BlockSpec((nb, n), lambda m: (0, 0))
    return pl.pallas_call(
        _first_vec_kernel,
        out_shape=(ow_shape, jax.ShapeDtypeStruct((nb, n), B.dtype)),
        grid=grid,
        in_specs=[p_spec, w_spec, b_spec],
        out_specs=(pl.BlockSpec((n, tm), lambda m: (0, m)), b_spec),
        compiler_params=pltpu.CompilerParams(
            dimension_semantics=("arbitrary",),  # vec output is grid-resident
            vmem_limit_bytes=_VMEM_LIMIT_BYTES),
    )(Pm, W_flat, B)


def middle_layer_apply(Pc, Pp, W_t, B=None):
    """W_t: (S, O, C); out_t[s] = Pc @ W_t[s] @ Pp^T.  B: (nb, O) -> B @ Pc^T."""
    S, O, C = W_t.shape
    pc_spec = pl.BlockSpec((O, O), lambda s: (0, 0))
    pp_spec = pl.BlockSpec((C, C), lambda s: (0, 0))
    w_spec = pl.BlockSpec((1, O, C), lambda s: (s, 0, 0))
    ow_shape = jax.ShapeDtypeStruct((S, O, C), W_t.dtype)
    if B is None:
        return pl.pallas_call(
            _middle_kernel,
            out_shape=ow_shape,
            grid=(S,),
            in_specs=[pc_spec, pp_spec, w_spec],
            out_specs=pl.BlockSpec((1, O, C), lambda s: (s, 0, 0)),
            compiler_params=pltpu.CompilerParams(
                dimension_semantics=("parallel",),
                vmem_limit_bytes=_VMEM_LIMIT_BYTES),
        )(Pc, Pp, W_t)
    nb = B.shape[0]
    b_spec = pl.BlockSpec((nb, O), lambda s: (0, 0))
    return pl.pallas_call(
        _middle_vec_kernel,
        out_shape=(ow_shape, jax.ShapeDtypeStruct((nb, O), B.dtype)),
        grid=(S,),
        in_specs=[pc_spec, pp_spec, w_spec, b_spec],
        out_specs=(pl.BlockSpec((1, O, C), lambda s: (s, 0, 0)), b_spec),
        compiler_params=pltpu.CompilerParams(
            dimension_semantics=("arbitrary",),
            vmem_limit_bytes=_VMEM_LIMIT_BYTES),
    )(Pc, Pp, W_t, B)


def last_layer_apply(Pp, W_t):
    """W_t: (S, O, C); out_t[s] = W_t[s] @ Pp^T."""
    S, O, C = W_t.shape
    return pl.pallas_call(
        _last_kernel,
        out_shape=jax.ShapeDtypeStruct((S, O, C), W_t.dtype),
        grid=(S,),
        in_specs=[pl.BlockSpec((C, C), lambda s: (0, 0)),
                  pl.BlockSpec((1, O, C), lambda s: (s, 0, 0))],
        out_specs=pl.BlockSpec((1, O, C), lambda s: (s, 0, 0)),
        compiler_params=pltpu.CompilerParams(
            dimension_semantics=("parallel",),
            vmem_limit_bytes=_VMEM_LIMIT_BYTES),
    )(Pp, W_t)


def vec_apply(Pm, B):
    """Standalone 1-D params in row form: (nb, n) -> B @ Pm^T (lane-dense)."""
    nb, n = B.shape
    return pl.pallas_call(
        _vec_kernel,
        out_shape=jax.ShapeDtypeStruct((nb, n), B.dtype),
        in_specs=[pl.BlockSpec((n, n), lambda: (0, 0)),
                  pl.BlockSpec((nb, n), lambda: (0, 0))],
        out_specs=pl.BlockSpec((nb, n), lambda: (0, 0)),
        compiler_params=pltpu.CompilerParams(
            vmem_limit_bytes=_VMEM_LIMIT_BYTES),
    )(Pm, B)


# ----------------------------------------------------------------------------
# ReparamNet.forward — exact port of the PyTorch control flow
# ----------------------------------------------------------------------------
def _plan(P, named_params):
    """Replicates the PyTorch loop (i arithmetic, negative-index wraparound and
    the early break) and records what to do with each parameter."""
    ops = [None] * len(named_params)  # None -> keep the cloned original
    i = 0
    for idx, (name, p2) in enumerate(named_params):
        shape = p2.shape
        if "bias" in name:
            i -= 1
            ops[idx] = ("vec", i)                 # P[i] @ b
        elif len(shape) == 1 and shape[0] == P[i - 1].shape[0]:
            i -= 1
            ops[idx] = ("vec", i)                 # P[i] @ b  (BN-style 1-D)
        elif "weight" in name:
            if i < len(P) and i == 0:
                ops[idx] = ("first", i)
            if i < len(P) and i > 0:
                ops[idx] = ("middle", i, i - 1)
            if i == len(P) and i > 0:
                ops[idx] = ("last", i - 1)
        i += 1
        if i > len(P):
            break
    return ops


def _middle_unfused(Pc, Pp, p):
    # Fallback mirroring the PyTorch two-view sequence exactly (only needed if
    # P[i].shape[0] != weight.shape[0], which never happens for ordinary convs).
    shape = p.shape
    y = first_layer_apply(Pc, p.reshape(Pc.shape[0], -1))
    y3 = y.reshape(shape[0], Pp.shape[0], -1)
    out_t = last_layer_apply(Pp, jnp.transpose(y3, (2, 0, 1)))
    return jnp.transpose(out_t, (1, 2, 0)).reshape(shape)


def reparam_forward(P, named_params):
    """P: list of (C_i, C_i) matrices.  named_params: list of (name, array).
    Returns the re-parameterized list of (name, array)."""
    out = [(name, p) for name, p in named_params]
    if len(P) == 0:
        return out
    nP = len(P)
    ops = _plan(P, named_params)
    n_params = len(named_params)
    idx = 0
    while idx < n_params:
        op = ops[idx]
        if op is None:
            idx += 1
            continue
        kind = op[0]
        name, p = named_params[idx]
        shape = p.shape

        if kind == "vec":  # 1-D param not fused into a preceding weight call
            Pm = P[op[1]]
            if p.ndim == 1 and p.shape[0] == Pm.shape[0]:
                new = vec_apply(Pm, p.reshape(1, -1)).reshape(shape)
            else:
                new = first_layer_apply(Pm, p.reshape(Pm.shape[0], -1)).reshape(shape)
            out[idx] = (name, new)
            idx += 1
            continue

        # Weight-style op: group the trailing 1-D params that use the same P.
        if kind == "first":
            pi = op[1]
            vec_pi = pi
        elif kind == "middle":
            pi, pj = op[1], op[2]
            vec_pi = pi
        else:  # "last" — the PyTorch loop breaks right after, no 1-D follows.
            pj = op[1]
            vec_pi = None

        vec_idxs = []
        j = idx + 1
        if vec_pi is not None:
            n_vec = P[vec_pi].shape[0]
            while (j < n_params and ops[j] is not None and ops[j][0] == "vec"
                   and ops[j][1] % nP == vec_pi % nP):
                vp = named_params[j][1]
                if vp.ndim == 1 and vp.shape[0] == n_vec:
                    vec_idxs.append(j)
                    j += 1
                else:
                    break
        B = jnp.stack([named_params[v][1] for v in vec_idxs]) if vec_idxs else None

        new_b = None
        if kind == "first":
            Pm = P[pi]
            w_flat = p.reshape(Pm.shape[0], -1)
            if B is None:
                new_w = first_layer_apply(Pm, w_flat)
            else:
                new_w, new_b = first_layer_apply(Pm, w_flat, B)
            new_w = new_w.reshape(shape)
        elif kind == "middle":
            Pc, Pp = P[pi], P[pj]
            if Pc.shape[0] == shape[0]:
                O, C = Pc.shape[0], Pp.shape[0]
                s_len = p.size // (O * C)
                w_t = jnp.transpose(p.reshape(O, C, s_len), (2, 0, 1))  # (S,O,C)
                if B is None:
                    out_t = middle_layer_apply(Pc, Pp, w_t)
                else:
                    out_t, new_b = middle_layer_apply(Pc, Pp, w_t, B)
                new_w = jnp.transpose(out_t, (1, 2, 0)).reshape(shape)
            else:
                new_w = _middle_unfused(Pc, Pp, p)
                if B is not None:
                    new_b = vec_apply(Pc, B)
        else:  # "last"
            Pp = P[pj]
            O, C = shape[0], Pp.shape[0]
            s_len = p.size // (O * C)
            w_t = jnp.transpose(p.reshape(O, C, s_len), (2, 0, 1))
            out_t = last_layer_apply(Pp, w_t)
            new_w = jnp.transpose(out_t, (1, 2, 0)).reshape(shape)

        out[idx] = (name, new_w)
        for r, v in enumerate(vec_idxs):
            vname, vp = named_params[v]
            out[v] = (vname, new_b[r].reshape(vp.shape))
        idx = j
    return out


# Pure-JAX reference (no Pallas) for correctness checking.
def reparam_forward_ref(P, named_params):
    out = [(name, p) for name, p in named_params]
    i = 0
    for idx, (name, p2) in enumerate(named_params):
        shape = p2.shape
        if "bias" in name:
            i -= 1
            out[idx] = (name, P[i] @ p2)
        elif len(shape) == 1 and shape[0] == P[i - 1].shape[0]:
            i -= 1
            out[idx] = (name, (P[i] @ p2.reshape(shape[0], -1)).reshape(shape))
        elif "weight" in name:
            if i < len(P) and i == 0:
                out[idx] = (name, (P[i] @ p2.reshape(P[i].shape[0], -1)).reshape(shape))
            if i < len(P) and i > 0:
                y = (P[i] @ p2.reshape(P[i].shape[0], -1)).reshape(
                    shape[0], P[i - 1].shape[0], -1)
                out[idx] = (name, jnp.einsum("cd,ods->ocs", P[i - 1], y).reshape(shape))
            if i == len(P) and i > 0:
                w3 = p2.reshape(shape[0], P[i - 1].shape[0], -1)
                out[idx] = (name, jnp.einsum("cd,ods->ocs", P[i - 1], w3).reshape(shape))
        i += 1
        if i > len(P):
            break
    return out


# ----------------------------------------------------------------------------
# Driver
# ----------------------------------------------------------------------------
if __name__ == "__main__":
    key = jax.random.PRNGKey(0)
    C_in, C1, C2, C3, k = 4, 8, 16, 8, 3
    keys = jax.random.split(key, 10)
    named_params = [
        ("conv1.weight", jax.random.normal(keys[0], (C1, C_in, k, k), jnp.float32)),
        ("conv1.bias",   jax.random.normal(keys[1], (C1,), jnp.float32)),
        ("conv2.weight", jax.random.normal(keys[2], (C2, C1, k, k), jnp.float32)),
        ("conv2.bias",   jax.random.normal(keys[3], (C2,), jnp.float32)),
        ("conv3.weight", jax.random.normal(keys[4], (C3, C2, k, k), jnp.float32)),
        ("conv3.bias",   jax.random.normal(keys[5], (C3,), jnp.float32)),
    ]

    # Test 1: permutation matrices (intended use) — results are exact.
    perm0 = jax.random.permutation(keys[6], C1)
    perm1 = jax.random.permutation(keys[7], C2)
    P_perm = [jnp.eye(C1, dtype=jnp.float32)[perm0],
              jnp.eye(C2, dtype=jnp.float32)[perm1]]
    got = [p for _, p in reparam_forward(P_perm, named_params)]
    jax.block_until_ready(got)
    want = [p for _, p in reparam_forward_ref(P_perm, named_params)]
    for g, w in zip(got, want):
        assert g.shape == w.shape and g.dtype == w.dtype
        assert jnp.allclose(g, w, atol=1e-5, rtol=1e-5), "mismatch (permutation P)"

    # Test 2: arbitrary dense P (kernels do not assume P is a permutation).
    P_rand = [0.1 * jax.random.normal(keys[8], (C1, C1), jnp.float32),
              0.1 * jax.random.normal(keys[9], (C2, C2), jnp.float32)]
    got = [p for _, p in reparam_forward(P_rand, named_params)]
    jax.block_until_ready(got)
    with jax.default_matmul_precision("float32"):
        want = [p for _, p in reparam_forward_ref(P_rand, named_params)]
    for g, w in zip(got, want):
        assert g.shape == w.shape
        assert jnp.allclose(g, w, atol=1e-4, rtol=1e-4), "mismatch (dense P)"

    print("KERNEL_OK")
</pallas_src>

<mosaic_0001>
module attributes {stable_mosaic.version = 11 : i64} {
  func.func @_first_vec_kernel(%arg0: i32, %arg1: memref<8x8xf32, #tpu.memory_space<vmem>>, %arg2: memref<8x36xf32, #tpu.memory_space<vmem>>, %arg3: memref<1x8xf32, #tpu.memory_space<vmem>>, %arg4: memref<8x36xf32, #tpu.memory_space<vmem>>, %arg5: memref<1x8xf32, #tpu.memory_space<vmem>>) attributes {dimension_semantics = [#tpu.dimension_semantics<arbitrary>], iteration_bounds = array<i64: 1>, scalar_prefetch = 0 : i64, scratch_operands = 0 : i64, tpu.core_type = #tpu.core_type<tc>, window_params = [{pipeline_mode = #tpu.pipeline_mode<synchronous>, transform_indices = @transform_0, window_bounds = array<i64: 8, 8>}, {transform_indices = @transform_1, window_bounds = array<i64: 8, 36>}, {pipeline_mode = #tpu.pipeline_mode<synchronous>, transform_indices = @transform_2, window_bounds = array<i64: 1, 8>}, {transform_indices = @transform_3, window_bounds = array<i64: 8, 36>}, {pipeline_mode = #tpu.pipeline_mode<synchronous>, transform_indices = @transform_4, window_bounds = array<i64: 1, 8>}]} {
    %c0 = arith.constant 0 : index
    %c0_0 = arith.constant 0 : index
    %0 = vector.load %arg1[%c0, %c0_0] : memref<8x8xf32, #tpu.memory_space<vmem>>, vector<8x8xf32>
    %c0_1 = arith.constant 0 : index
    %c0_2 = arith.constant 0 : index
    %1 = vector.load %arg2[%c0_1, %c0_2] : memref<8x36xf32, #tpu.memory_space<vmem>>, vector<8x36xf32>
    %cst = arith.constant dense<0.000000e+00> : vector<8x36xf32>
    %2 = tpu.matmul %0, %1, %cst {dimension_numbers = #tpu.dot_dimension_numbers<[1], [0], [0], [1], [0, 0, 1, 1], [], []>} : vector<8x8xf32>, vector<8x36xf32>, vector<8x36xf32> -> vector<8x36xf32>
    %c0_3 = arith.constant 0 : index
    %c0_4 = arith.constant 0 : index
    %3 = vector.load %arg4[%c0_3, %c0_4] : memref<8x36xf32, #tpu.memory_space<vmem>>, vector<8x36xf32>
    tpu.vector_store %arg4[%c0_3, %c0_4], %2 {strides = array<i32>} : memref<8x36xf32, #tpu.memory_space<vmem>>, vector<8x36xf32>,
    %c0_i32 = arith.constant 0 : i32
    %4 = arith.cmpi eq, %arg0, %c0_i32 : i32
    %5 = arith.extui %4 : i1 to i32
    %c0_i32_5 = arith.constant 0 : i32
    %6 = arith.cmpi ne, %5, %c0_i32_5 : i32
    scf.if %6 {
      %c0_6 = arith.constant 0 : index
      %c0_7 = arith.constant 0 : index
      %7 = vector.load %arg3[%c0_6, %c0_7] : memref<1x8xf32, #tpu.memory_space<vmem>>, vector<1x8xf32>
      %c0_8 = arith.constant 0 : index
      %c0_9 = arith.constant 0 : index
      %8 = vector.load %arg1[%c0_8, %c0_9] : memref<8x8xf32, #tpu.memory_space<vmem>>, vector<8x8xf32>
      %cst_10 = arith.constant dense<0.000000e+00> : vector<1x8xf32>
      %9 = tpu.matmul %7, %8, %cst_10 {dimension_numbers = #tpu.dot_dimension_numbers<[1], [1], [0], [0], [0, 0, 1, 0], [], []>} : vector<1x8xf32>, vector<8x8xf32>, vector<1x8xf32> -> vector<1x8xf32>
      %c0_11 = arith.constant 0 : index
      %c0_12 = arith.constant 0 : index
      %10 = vector.load %arg5[%c0_11, %c0_12] : memref<1x8xf32, #tpu.memory_space<vmem>>, vector<1x8xf32>
      tpu.vector_store %arg5[%c0_11, %c0_12], %9 {strides = array<i32>} : memref<1x8xf32, #tpu.memory_space<vmem>>, vector<1x8xf32>,
    } else {
    }
    return
  }
  func.func @transform_0(%arg0: i32) -> (i32, i32) {
    %c0_i32 = arith.constant 0 : i32
    %c0_i32_0 = arith.constant 0 : i32
    %c0_i32_1 = arith.constant 0 : i32
    return %c0_i32, %c0_i32_0 : i32, i32
  }
  func.func @transform_1(%arg0: i32) -> (i32, i32) {
    %c0_i32 = arith.constant 0 : i32
    %c0_i32_0 = arith.constant 0 : i32
    return %c0_i32, %arg0 : i32, i32
  }
  func.func @transform_2(%arg0: i32) -> (i32, i32) {
    %c0_i32 = arith.constant 0 : i32
    %c0_i32_0 = arith.constant 0 : i32
    %c0_i32_1 = arith.constant 0 : i32
    return %c0_i32, %c0_i32_0 : i32, i32
  }
  func.func @transform_3(%arg0: i32) -> (i32, i32) {
    %c0_i32 = arith.constant 0 : i32
    %c0_i32_0 = arith.constant 0 : i32
    return %c0_i32, %arg0 : i32, i32
  }
  func.func @transform_4(%arg0: i32) -> (i32, i32) {
    %c0_i32 = arith.constant 0 : i32
    %c0_i32_0 = arith.constant 0 : i32
    %c0_i32_1 = arith.constant 0 : i32
    return %c0_i32, %c0_i32_0 : i32, i32
  }
}

</mosaic_0001>

<bundles_post_ra>
// kernel: tpu_custom_call.1
= control target key start
LH: loop header
LB: loop body
LE: loop exit
PB: predicated region body
PF: predicated region fallthrough
CT: control target
= control target key end

     0   :  { %10 = vsyncpa [#allocation3], 0  ;;  %s391_s0 = inlined_call_operand.hbm [shape: f32[8,8], index: 0, kind: input, shape index: {}]   ;;  %s392_s1 = inlined_call_operand.hbm [shape: f32[8,36], index: 1, kind: input, shape index: {}]   ;;  %s393_s2 = inlined_call_operand.vmem [shape: f32[1,8], index: 2, kind: input, shape index: {}]   ;;  %s394_s3 = inlined_call_operand.hbm [shape: f32[8,36], index: 3, kind: output, shape index: {0}]   ;;  %s395_s4 = inlined_call_operand.hbm [shape: f32[1,8], index: 4, kind: output, shape index: {1}]  }
   0x1   :  { %11 = vsyncpa [#allocation6], 0 }
   0x2   :  { %12 = vsyncpa [#allocation4], 0 }
   0x3   :  { %13 = vsyncpa [#allocation9], 0  ;;  %s345_s15 = smov [#allocation2]   ;;  %s346_s17 = smov [#allocation5]  }
   0x4   :  { %s20_s16 = sshll.u32 %s345_s15, 4  ;;  %s30_s18 = sshll.u32 %s346_s17, 4  ;;  %s21_s16 = int_to_ptr.vmem [resolvable:$true] %s20_s16  ;;  %s31_s18 = int_to_ptr.vmem [resolvable:$true] %s30_s18 }
   0x5   :  { %s265_s19 = scalar_lea.vmem %s21_s16, 128  ;;  %p270_p1 = scmp.lt.s32.totalorder %s21_s16, %s21_s16 }
   0x6   :  { %p266_p0 = scmp.ne.s32.totalorder %s21_s16, %s265_s19  ;;  %p271_p2 = scmp.lt.s32.totalorder %s265_s19, %s265_s19 }
   0x8   :  { %p272_p3 = por %p271_p2, %p270_p1 }
   0xa   :  { %p273_p4 = pnand %p272_p3, %p266_p0 }
   0xc   :  { %276 = shalt.err (!%p273_p4)
}
   0xd   :  { %23 = dma.hbm_to_vmem [thread:$0]  %s391_s0, 128, %s21_s16, [#allocation3]  }
   0xe   :  { %s285_s22 = scalar_lea.vmem %s31_s18, 128  ;;  %p290_p6 = scmp.lt.s32.totalorder %s31_s18, %s31_s18 }
   0xf   :  { %p286_p5 = scmp.ne.s32.totalorder %s31_s18, %s285_s22  ;;  %p291_p7 = scmp.lt.s32.totalorder %s285_s22, %s285_s22 }
  0x11   :  { %p292_p8 = por %p291_p7, %p290_p6 }
  0x13   :  { %p293_p9 = pnand %p292_p8, %p286_p5 }
  0x15   :  { %296 = shalt.err (!%p293_p9)
}
  0x16   :  { %33 = dma.hbm_to_vmem [thread:$0]  %s392_s1, 128, %s31_s18, [#allocation6]  }
  0x17   :  { %337 = dma.done.wait [#allocation3], 128  }
  0x18   :  { %338 = vsyncadd [#allocation3], 4294967168 }
  0x19   :  { %339 = dma.done.wait [#allocation6], 128  }
  0x1a   :  { %340 = vsyncadd [#allocation6], 4294967168  ;;  %v347_v0 = vmov 0.0   ;;  %vm348_vm0 = vmmov 0   ;;  %vm44_vm1 = vcmask 64512   ;;  %v43_v1 = vld [vmem:[#allocation5] sm:$0xff] }
  0x1b   :  { %241 = vmatprep.subr.mxu0 %v347_v0  ;;  %246 = vmatprep.subr.mxu1 %v347_v0  ;;  %v125_v2 = vld [vmem:[#allocation2] sm:$0xff]  ;;  %s349_s1 = smov [#allocation7]   ;;  %vm118_vm2 = vcmask 293888   ;;  %s350_s27 = smov [#allocation8]   ;;  %vm202_vm3 = vcmask 57344  }
  0x1c   :  { %243 = vmatprep.mubr.msk.f32.mxu0 %vm348_vm0, %v347_v0  ;;  %248 = vmatprep.mubr.msk.f32.mxu1 %vm348_vm0, %v347_v0  ;;  %v124_v3 = vld [vmem:[%s393_s2] sm:$0x1]  ;;  %s210_s26 = sshll.u32 %s349_s1, 4  ;;  %s220_s28 = sshll.u32 %s350_s27, 4  ;;  %s211_s26 = int_to_ptr.vmem [resolvable:$true] %s210_s26  ;;  %s221_s28 = int_to_ptr.vmem [resolvable:$true] %s220_s28 }
  0x1d   :  { %242 = vmatpush3.msra.mxu0 %v43_v1  ;;  %247 = vmatpush3.xpose.msk.msra.mxu1 %vm44_vm1, %v125_v2  ;;  %s297_s29 = scalar_lea.vmem %s211_s26, 128  ;;  %p302_p11 = scmp.lt.s32.totalorder %s211_s26, %s211_s26 }
  0x1e   :  { %244 = vmatmul.mubr.msk.f32.vlgmr.msra.gmra.mxu0 %vm44_vm1, %v125_v2  ;;  %p298_p10 = scmp.ne.s32.totalorder %s211_s26, %s297_s29  ;;  %p303_p12 = scmp.lt.s32.totalorder %s297_s29, %s297_s29 }
  0x20   :  { %249 = vmatmul.mubr.msk.f32.vlgmr.msra.gmra.mxu1 %vm44_vm1, %v124_v3  ;;  %p304_p13 = por %p303_p12, %p302_p11 }
  0x22   :  { %p305_p0 = pnand %p304_p13, %p298_p10 }
  0xde   :  { %v114_v4 = vpop.f32.mrf.mxu0 }
  0xdf   :  { %119 = vst.msk [vmem:[#allocation7] sm:$0xff] %vm118_vm2, %v114_v4 }
  0xe0   :  { %v245_v5 = vpop.f32.mrf.mxu0  ;;  %v198_v6 = vpop.f32.mrf.mxu1 }
  0xe1   :  { %308 = shalt.err (!%p305_p0)
}
  0xe2   :  { %213 = dma.vmem_to_hbm [thread:$0]  %s211_s26, 128, %s394_s3, [#allocation4]   ;;  %203 = vst.msk [vmem:[#allocation8] sm:$0x1] %vm202_vm3, %v198_v6  ;;  %v250_v7 = vpop.f32.mrf.mxu1 }
  0xe3   :  { %s317_s5 = scalar_lea.vmem %s221_s28, 16  ;;  %s321_s6 = scalar_lea.vmem %s221_s28, 32 }
  0xe4   :  { %p318_p1 = scmp.ne.s32.totalorder %s221_s28, %s317_s5  ;;  %p322_p2 = scmp.lt.s32.totalorder %s221_s28, %s221_s28 }
  0xe5   :  { %p323_p3 = scmp.lt.s32.totalorder %s321_s6, %s317_s5 }
  0xe7   :  { %p324_p4 = por %p323_p3, %p322_p2 }
  0xe9   :  { %p325_p5 = pnand %p324_p4, %p318_p1 }
  0xeb   :  { %328 = shalt.err (!%p325_p5)
}
  0xec   :  { %223 = dma.vmem_to_hbm [thread:$0]  %s221_s28, 16, %s395_s4, [#allocation9]  }
  0xed   :  { %341 = dma.done.wait [#allocation4], 128  }
  0xee   :  { %342 = vsyncadd [#allocation4], 4294967168 }
  0xef   :  { %343 = dma.done.wait [#allocation9], 16  }
  0xf0   :  { %344 = vsyncadd [#allocation9], 4294967280 }
  0xf1   :  { %230 = vsyncpa [#allocation3], 1 }
  0xf2   :  { %231 = vsyncpa [#allocation6], 1 }
  0xf3   :  { %232 = vsyncpa [#allocation4], 1 }
  0xf4   :  { %233 = vsyncpa [#allocation9], 1 }

</bundles_post_ra>
